<compile_context>
chip_gen: v7x
topology: tpu7x:2x2x1
jax: 0.10.0
libtpu: 0.0.40
codegen_flags: <defaults>
</compile_context>

<pallas_src>
import functools

import jax
import jax.numpy as jnp
from jax.experimental import pallas as pl
from jax.experimental.pallas import tpu as pltpu

EPS = 1e-5  # PyTorch nn.LayerNorm default


def _round_up(x, m):
    return ((x + m - 1) // m) * m


def _vmem_capacity_bytes():
    """Physical VMEM of the local TPU; conservative 64 MiB if unknown."""
    try:
        info = pltpu.get_tpu_info()
        cap = getattr(info, "vmem_capacity_bytes", None)
        if cap:
            return int(cap)
    except Exception:
        pass
    return 64 << 20


def _invariant_spec(block_shape, index_map, single_buffer):
    """BlockSpec for a grid-invariant operand, single-buffered when supported."""
    if single_buffer:
        try:
            return pl.BlockSpec(block_shape, index_map,
                                pipeline_mode=pl.Buffered(1))
        except Exception:
            pass  # older JAX: fall back to default (double) buffering
    return pl.BlockSpec(block_shape, index_map)


def _patch_merging_kernel(x_ref, w_ref, b_ref, o_ref, *, inv_c4, mxu_dtype):
    # x_ref: (TM, 4C) merged-patch rows, feature order (dh, dw, c)  (mxu_dtype)
    # w_ref: (4C, 2C) folded gamma*W                                (mxu_dtype)
    # b_ref: (1, 2C)  folded beta@W                                 (f32)
    # o_ref: (TM, 2C)
    x = x_ref[...].astype(jnp.float32)
    # One-pass LayerNorm statistics (biased variance, matching torch).
    mean = jnp.sum(x, axis=-1, keepdims=True) * inv_c4
    ex2 = jnp.sum(x * x, axis=-1, keepdims=True) * inv_c4
    var = jnp.maximum(ex2 - mean * mean, 0.0)
    inv_std = jax.lax.rsqrt(var + EPS)
    xn = ((x - mean) * inv_std).astype(mxu_dtype)
    acc = jnp.dot(xn, w_ref[...], preferred_element_type=jnp.float32)
    o_ref[...] = (acc + b_ref[...]).astype(o_ref.dtype)


def patch_merging_forward(x_nchw, gamma, beta, weight_t, *, tile_m=1024,
                          mxu_dtype=jnp.bfloat16, single_buffer_weights=True,
                          out_layout="NCHW"):
    """PatchMerging forward: [B, C, H, W] -> [B, 2C, H//2, W//2].

    gamma/beta: LayerNorm(4C) affine (torch feature order c*4+dh*2+dw).
    weight_t:   Linear(4C->2C, bias=False) weight, transposed to [4C, 2C].
    out_layout: "NCHW" (module semantics, default) or "NHWC" (lane-dense,
                skips the final transpose / one full HBM pass).
    """
    B, C, H, W = x_nchw.shape
    assert H % 2 == 0 and W % 2 == 0, "spatial dims must be even"
    Ho, Wo = H // 2, W // 2
    C4 = 4 * C
    C2out = 2 * C
    N = B * Ho * Wo
    out_dtype = x_nchw.dtype

    # --- single wrapper-side layout pass: NCHW -> slab [N, 4C] with feature
    # order (dh, dw, c). The bf16 downcast is fused into this same copy so the
    # slab write and the kernel's dominant input read are half-width.
    xs = x_nchw.reshape(B, C, Ho, 2, Wo, 2)          # (b, c, ho, dh, wo, dw)
    xs = jnp.transpose(xs, (0, 2, 4, 3, 5, 1))       # (b, ho, wo, dh, dw, c)
    xs = xs.reshape(N, C4).astype(mxu_dtype)
    # TODO(synk): fusing this producer into the pallas_call input DMA
    # (CompilerParams(allow_input_fusion=...) or an NHWC-input fast path) would
    # remove the remaining extra HBM pass on the input.

    # --- fold LayerNorm affine into the projection, permuting torch's feature
    # order (c*4 + dh*2 + dw) into the slab order (dh*2C + dw*C + c).
    g_p = jnp.transpose(gamma.reshape(C, 2, 2), (1, 2, 0)).reshape(C4)
    b_p = jnp.transpose(beta.reshape(C, 2, 2), (1, 2, 0)).reshape(C4)
    w_p = jnp.transpose(weight_t.reshape(C, 2, 2, C2out),
                        (1, 2, 0, 3)).reshape(C4, C2out)
    w_p32 = w_p.astype(jnp.float32)
    w_fold = (g_p.astype(jnp.float32)[:, None] * w_p32).astype(mxu_dtype)
    bias = (b_p.astype(jnp.float32) @ w_p32).reshape(1, C2out)

    # --- row-tile selection + honest, generation-aware VMEM budget.
    slab_bytes = jnp.dtype(mxu_dtype).itemsize
    out_bytes = jnp.dtype(out_dtype).itemsize
    c4_pad = _round_up(C4, 128)           # lane padding of the input block
    co_pad = _round_up(C2out, 128)        # lane padding of the output block
    n_wbuf = 1 if single_buffer_weights else 2

    def est_vmem(tm):
        io = 2 * tm * c4_pad * slab_bytes + 2 * tm * co_pad * out_bytes
        wgt = n_wbuf * (_round_up(C4, 8) * co_pad * slab_bytes + 8 * co_pad * 4)
        # kernel-internal f32 temporaries (x, x*x / xn, centered) + f32 acc
        scratch = (3 * tm * c4_pad + 2 * tm * co_pad) * 4
        return io + wgt + scratch

    tm = max(8, (min(int(tile_m), N) // 8) * 8)
    if N >= 16 and pl.cdiv(N, tm) < 2:
        # give v7x's two TensorCores at least one row tile each
        tm = max(8, _round_up(pl.cdiv(N, 2), 8))
    vmem_cap = int(0.75 * _vmem_capacity_bytes())   # ~48 MiB v7x, ~96 MiB v5e/v6e
    while tm > 8 and est_vmem(tm) > vmem_cap:
        tm = max(8, ((tm // 2) // 8) * 8)
    vmem_limit = int(min(max(est_vmem(tm) + (4 << 20), 16 << 20), vmem_cap))

    grid = (pl.cdiv(N, tm),)
    kernel = functools.partial(_patch_merging_kernel,
                               inv_c4=1.0 / float(C4), mxu_dtype=mxu_dtype)

    out_flat = pl.pallas_call(
        kernel,
        out_shape=jax.ShapeDtypeStruct((N, C2out), out_dtype),
        grid_spec=pltpu.PrefetchScalarGridSpec(
            num_scalar_prefetch=0,
            grid=grid,
            in_specs=[
                pl.BlockSpec((tm, C4), lambda i: (i, 0)),              # rows
                _invariant_spec((C4, C2out), lambda i: (0, 0),
                                single_buffer_weights),                # W'
                _invariant_spec((1, C2out), lambda i: (0, 0),
                                single_buffer_weights),                # b'
            ],
            out_specs=pl.BlockSpec((tm, C2out), lambda i: (i, 0)),
        ),
        compiler_params=pltpu.CompilerParams(
            dimension_semantics=("parallel",),
            vmem_limit_bytes=vmem_limit,
        ),
    )(xs, w_fold, bias)

    out = out_flat.reshape(B, Ho, Wo, C2out)
    if out_layout == "NHWC":
        return out                                 # lane-dense, no extra pass
    # Module semantics: NCHW (costs one extra read+write of the output in HBM).
    return jnp.transpose(out, (0, 3, 1, 2))


def _reference(x_nchw, gamma, beta, weight_t):
    """Pure-f32 reference matching the PyTorch module semantics."""
    B, C, H, W = x_nchw.shape
    Ho, Wo = H // 2, W // 2
    x = jnp.transpose(x_nchw, (0, 2, 3, 1))                       # B,H,W,C
    x = x.reshape(B, Ho, 2, Wo, 2, C)
    # torch unfold/unfold/reshape feature order: c*4 + dh*2 + dw
    x = jnp.transpose(x, (0, 1, 3, 5, 2, 4)).reshape(B, Ho, Wo, 4 * C)
    x = x.astype(jnp.float32)
    mean = jnp.mean(x, axis=-1, keepdims=True)
    var = jnp.mean((x - mean) ** 2, axis=-1, keepdims=True)
    xn = (x - mean) * jax.lax.rsqrt(var + EPS) * gamma + beta
    y = xn @ weight_t.astype(jnp.float32)
    return jnp.transpose(y, (0, 3, 1, 2)).astype(x_nchw.dtype)


if __name__ == "__main__":
    key = jax.random.PRNGKey(0)
    k_x, k_g, k_b, k_w = jax.random.split(key, 4)

    B, C, H, W = 2, 4, 16, 16
    x = jax.random.normal(k_x, (B, C, H, W), dtype=jnp.float32)

    # Parameters per PatchMerging.__init__:
    #   LayerNorm(4C): gamma [4C], beta [4C]; Linear(4C -> 2C, bias=False): [2C, 4C]
    gamma = 1.0 + 0.1 * jax.random.normal(k_g, (4 * C,), dtype=jnp.float32)
    beta = 0.1 * jax.random.normal(k_b, (4 * C,), dtype=jnp.float32)
    w_torch = 0.1 * jax.random.normal(k_w, (2 * C, 4 * C), dtype=jnp.float32)
    weight_t = w_torch.T  # kernel consumes [4C, 2C]

    try:
        fwd = jax.jit(patch_merging_forward)
        out = jax.block_until_ready(fwd(x, gamma, beta, weight_t))
    except Exception:
        # pl.Buffered(1) single-buffering of the invariant operands is a recent
        # feature; fall back to default double buffering if this build rejects it.
        fwd = jax.jit(functools.partial(patch_merging_forward,
                                        single_buffer_weights=False))
        out = jax.block_until_ready(fwd(x, gamma, beta, weight_t))

    ref = _reference(x, gamma, beta, weight_t)
    assert out.shape == (B, 2 * C, H // 2, W // 2), out.shape
    out32 = out.astype(jnp.float32)
    ref32 = ref.astype(jnp.float32)
    max_err = float(jnp.max(jnp.abs(out32 - ref32)))
    # bf16 slab + bf16 MXU operands => compare against the pure-f32 reference loosely.
    assert jnp.allclose(out32, ref32, atol=3e-2, rtol=3e-2), (
        "mismatch vs reference, max abs diff = " + str(max_err))

    print("KERNEL_OK")
</pallas_src>

<mosaic_0001>
module attributes {stable_mosaic.version = 11 : i64} {
  func.func @_patch_merging_kernel(%arg0: i32, %arg1: memref<64x16xbf16, #tpu.memory_space<vmem>>, %arg2: memref<16x8xbf16, #tpu.memory_space<vmem>>, %arg3: memref<1x8xf32, #tpu.memory_space<vmem>>, %arg4: memref<64x8xf32, #tpu.memory_space<vmem>>) attributes {dimension_semantics = [#tpu.dimension_semantics<parallel>], iteration_bounds = array<i64: 2>, scalar_prefetch = 0 : i64, scratch_operands = 0 : i64, tpu.core_type = #tpu.core_type<tc>, window_params = [{transform_indices = @transform_0, window_bounds = array<i64: 64, 16>}, {pipeline_mode = #tpu.pipeline_mode<synchronous>, transform_indices = @transform_1, window_bounds = array<i64: 16, 8>}, {pipeline_mode = #tpu.pipeline_mode<synchronous>, transform_indices = @transform_2, window_bounds = array<i64: 1, 8>}, {transform_indices = @transform_3, window_bounds = array<i64: 64, 8>}]} {
    %c0 = arith.constant 0 : index
    %c0_0 = arith.constant 0 : index
    %0 = vector.load %arg1[%c0, %c0_0] : memref<64x16xbf16, #tpu.memory_space<vmem>>, vector<64x16xbf16>
    %1 = arith.extf %0 : vector<64x16xbf16> to vector<64x16xf32>
    %cst = arith.constant dense<0.000000e+00> : vector<64xf32>
    %2 = vector.multi_reduction <add>, %1, %cst [1] : vector<64x16xf32> to vector<64xf32>
    %3 = vector.shape_cast %2 : vector<64xf32> to vector<64x1xf32>
    %cst_1 = arith.constant 6.250000e-02 : f32
    %4 = vector.broadcast %cst_1 : f32 to vector<64x1xf32>
    %5 = arith.mulf %3, %4 : vector<64x1xf32>
    %6 = arith.mulf %1, %1 : vector<64x16xf32>
    %cst_2 = arith.constant dense<0.000000e+00> : vector<64xf32>
    %7 = vector.multi_reduction <add>, %6, %cst_2 [1] : vector<64x16xf32> to vector<64xf32>
    %8 = vector.shape_cast %7 : vector<64xf32> to vector<64x1xf32>
    %cst_3 = arith.constant 6.250000e-02 : f32
    %9 = vector.broadcast %cst_3 : f32 to vector<64x1xf32>
    %10 = arith.mulf %8, %9 : vector<64x1xf32>
    %11 = arith.mulf %5, %5 : vector<64x1xf32>
    %12 = arith.subf %10, %11 : vector<64x1xf32>
    %cst_4 = arith.constant 0.000000e+00 : f32
    %13 = vector.broadcast %cst_4 : f32 to vector<64x1xf32>
    %14 = arith.maximumf %12, %13 : vector<64x1xf32>
    %cst_5 = arith.constant 9.99999974E-6 : f32
    %15 = vector.broadcast %cst_5 : f32 to vector<64x1xf32>
    %16 = arith.addf %14, %15 : vector<64x1xf32>
    %17 = math.rsqrt %16 : vector<64x1xf32>
    %18 = vector.broadcast %5 : vector<64x1xf32> to vector<64x16xf32>
    %19 = arith.subf %1, %18 : vector<64x16xf32>
    %20 = vector.broadcast %17 : vector<64x1xf32> to vector<64x16xf32>
    %21 = arith.mulf %19, %20 : vector<64x16xf32>
    %22 = arith.truncf %21 : vector<64x16xf32> to vector<64x16xbf16>
    %c0_6 = arith.constant 0 : index
    %c0_7 = arith.constant 0 : index
    %23 = vector.load %arg2[%c0_6, %c0_7] : memref<16x8xbf16, #tpu.memory_space<vmem>>, vector<16x8xbf16>
    %cst_8 = arith.constant dense<0.000000e+00> : vector<64x8xf32>
    %24 = tpu.matmul %22, %23, %cst_8 {dimension_numbers = #tpu.dot_dimension_numbers<[1], [0], [0], [1], [0, 0, 1, 1], [], []>} : vector<64x16xbf16>, vector<16x8xbf16>, vector<64x8xf32> -> vector<64x8xf32>
    %c0_9 = arith.constant 0 : index
    %c0_10 = arith.constant 0 : index
    %25 = vector.load %arg3[%c0_9, %c0_10] : memref<1x8xf32, #tpu.memory_space<vmem>>, vector<1x8xf32>
    %26 = vector.broadcast %25 : vector<1x8xf32> to vector<64x8xf32>
    %27 = arith.addf %24, %26 : vector<64x8xf32>
    %c0_11 = arith.constant 0 : index
    %c0_12 = arith.constant 0 : index
    %28 = vector.load %arg4[%c0_11, %c0_12] : memref<64x8xf32, #tpu.memory_space<vmem>>, vector<64x8xf32>
    tpu.vector_store %arg4[%c0_11, %c0_12], %27 {strides = array<i32>} : memref<64x8xf32, #tpu.memory_space<vmem>>, vector<64x8xf32>,
    return
  }
  func.func @transform_0(%arg0: i32) -> (i32, i32) {
    %c0_i32 = arith.constant 0 : i32
    %c0_i32_0 = arith.constant 0 : i32
    return %arg0, %c0_i32 : i32, i32
  }
  func.func @transform_1(%arg0: i32) -> (i32, i32) {
    %c0_i32 = arith.constant 0 : i32
    %c0_i32_0 = arith.constant 0 : i32
    %c0_i32_1 = arith.constant 0 : i32
    return %c0_i32, %c0_i32_0 : i32, i32
  }
  func.func @transform_2(%arg0: i32) -> (i32, i32) {
    %c0_i32 = arith.constant 0 : i32
    %c0_i32_0 = arith.constant 0 : i32
    %c0_i32_1 = arith.constant 0 : i32
    return %c0_i32, %c0_i32_0 : i32, i32
  }
  func.func @transform_3(%arg0: i32) -> (i32, i32) {
    %c0_i32 = arith.constant 0 : i32
    %c0_i32_0 = arith.constant 0 : i32
    return %arg0, %c0_i32 : i32, i32
  }
}

module attributes {stable_mosaic.version = 11 : i64} {
  func.func @_patch_merging_kernel(%arg0: i32, %arg1: memref<64x16xbf16, #tpu.memory_space<vmem>>, %arg2: memref<16x8xbf16, #tpu.memory_space<vmem>>, %arg3: memref<1x8xf32, #tpu.memory_space<vmem>>, %arg4: memref<64x8xf32, #tpu.memory_space<vmem>>) attributes {dimension_semantics = [#tpu.dimension_semantics<parallel>], iteration_bounds = array<i64: 2>, scalar_prefetch = 0 : i64, scratch_operands = 0 : i64, tpu.core_type = #tpu.core_type<tc>, window_params = [{transform_indices = @transform_0, window_bounds = array<i64: 64, 16>}, {pipeline_mode = #tpu.pipeline_mode<synchronous>, transform_indices = @transform_1, window_bounds = array<i64: 16, 8>}, {pipeline_mode = #tpu.pipeline_mode<synchronous>, transform_indices = @transform_2, window_bounds = array<i64: 1, 8>}, {transform_indices = @transform_3, window_bounds = array<i64: 64, 8>}]} {
    %c0 = arith.constant 0 : index
    %c0_0 = arith.constant 0 : index
    %0 = vector.load %arg1[%c0, %c0_0] : memref<64x16xbf16, #tpu.memory_space<vmem>>, vector<64x16xbf16>
    %1 = arith.extf %0 : vector<64x16xbf16> to vector<64x16xf32>
    %cst = arith.constant dense<0.000000e+00> : vector<64xf32>
    %2 = vector.multi_reduction <add>, %1, %cst [1] : vector<64x16xf32> to vector<64xf32>
    %3 = vector.shape_cast %2 : vector<64xf32> to vector<64x1xf32>
    %cst_1 = arith.constant 6.250000e-02 : f32
    %4 = vector.broadcast %cst_1 : f32 to vector<64x1xf32>
    %5 = arith.mulf %3, %4 : vector<64x1xf32>
    %6 = arith.mulf %1, %1 : vector<64x16xf32>
    %cst_2 = arith.constant dense<0.000000e+00> : vector<64xf32>
    %7 = vector.multi_reduction <add>, %6, %cst_2 [1] : vector<64x16xf32> to vector<64xf32>
    %8 = vector.shape_cast %7 : vector<64xf32> to vector<64x1xf32>
    %cst_3 = arith.constant 6.250000e-02 : f32
    %9 = vector.broadcast %cst_3 : f32 to vector<64x1xf32>
    %10 = arith.mulf %8, %9 : vector<64x1xf32>
    %11 = arith.mulf %5, %5 : vector<64x1xf32>
    %12 = arith.subf %10, %11 : vector<64x1xf32>
    %cst_4 = arith.constant 0.000000e+00 : f32
    %13 = vector.broadcast %cst_4 : f32 to vector<64x1xf32>
    %14 = arith.maximumf %12, %13 : vector<64x1xf32>
    %cst_5 = arith.constant 9.99999974E-6 : f32
    %15 = vector.broadcast %cst_5 : f32 to vector<64x1xf32>
    %16 = arith.addf %14, %15 : vector<64x1xf32>
    %17 = math.rsqrt %16 : vector<64x1xf32>
    %18 = vector.broadcast %5 : vector<64x1xf32> to vector<64x16xf32>
    %19 = arith.subf %1, %18 : vector<64x16xf32>
    %20 = vector.broadcast %17 : vector<64x1xf32> to vector<64x16xf32>
    %21 = arith.mulf %19, %20 : vector<64x16xf32>
    %22 = arith.truncf %21 : vector<64x16xf32> to vector<64x16xbf16>
    %c0_6 = arith.constant 0 : index
    %c0_7 = arith.constant 0 : index
    %23 = vector.load %arg2[%c0_6, %c0_7] : memref<16x8xbf16, #tpu.memory_space<vmem>>, vector<16x8xbf16>
    %cst_8 = arith.constant dense<0.000000e+00> : vector<64x8xf32>
    %24 = tpu.matmul %22, %23, %cst_8 {dimension_numbers = #tpu.dot_dimension_numbers<[1], [0], [0], [1], [0, 0, 1, 1], [], []>} : vector<64x16xbf16>, vector<16x8xbf16>, vector<64x8xf32> -> vector<64x8xf32>
    %c0_9 = arith.constant 0 : index
    %c0_10 = arith.constant 0 : index
    %25 = vector.load %arg3[%c0_9, %c0_10] : memref<1x8xf32, #tpu.memory_space<vmem>>, vector<1x8xf32>
    %26 = vector.broadcast %25 : vector<1x8xf32> to vector<64x8xf32>
    %27 = arith.addf %24, %26 : vector<64x8xf32>
    %c0_11 = arith.constant 0 : index
    %c0_12 = arith.constant 0 : index
    %28 = vector.load %arg4[%c0_11, %c0_12] : memref<64x8xf32, #tpu.memory_space<vmem>>, vector<64x8xf32>
    tpu.vector_store %arg4[%c0_11, %c0_12], %27 {strides = array<i32>} : memref<64x8xf32, #tpu.memory_space<vmem>>, vector<64x8xf32>,
    return
  }
  func.func @transform_0(%arg0: i32) -> (i32, i32) {
    %c0_i32 = arith.constant 0 : i32
    %c0_i32_0 = arith.constant 0 : i32
    return %arg0, %c0_i32 : i32, i32
  }
  func.func @transform_1(%arg0: i32) -> (i32, i32) {
    %c0_i32 = arith.constant 0 : i32
    %c0_i32_0 = arith.constant 0 : i32
    %c0_i32_1 = arith.constant 0 : i32
    return %c0_i32, %c0_i32_0 : i32, i32
  }
  func.func @transform_2(%arg0: i32) -> (i32, i32) {
    %c0_i32 = arith.constant 0 : i32
    %c0_i32_0 = arith.constant 0 : i32
    %c0_i32_1 = arith.constant 0 : i32
    return %c0_i32, %c0_i32_0 : i32, i32
  }
  func.func @transform_3(%arg0: i32) -> (i32, i32) {
    %c0_i32 = arith.constant 0 : i32
    %c0_i32_0 = arith.constant 0 : i32
    return %arg0, %c0_i32 : i32, i32
  }
}

</mosaic_0001>

<bundles_post_ra>
// kernel: patch_merging_forward.1
= control target key start
LH: loop header
LB: loop body
LE: loop exit
PB: predicated region body
PF: predicated region fallthrough
CT: control target
= control target key end

     0   :  { %s587_s12 = smov 0   ;;  %s730_s0 = inlined_call_operand.vmem [shape: bf16[128,16], index: 0, kind: input, shape index: {}]   ;;  %s731_s1 = inlined_call_operand.vmem [shape: bf16[16,8], index: 1, kind: input, shape index: {}]   ;;  %s732_s2 = inlined_call_operand.vmem [shape: f32[1,8], index: 2, kind: input, shape index: {}]   ;;  %s733_s3 = inlined_call_operand.vmem [shape: f32[128,8], index: 3, kind: output, shape index: {}]  }
   0x1 LB: > { %s481_s13 = sadd.s32 4294967295, %s565_s12   ;;  %p485_p0 = scmp.ge.s32.totalorder %s565_s12, 1  ;;  %s565_s12 = sphi %s587_s12, %s13_s12  }
   0x2   : > { %p138_p1 = scmp.lt.s32.totalorder %s565_s12, 3 }
   0x4   : > { %p139_p2 = pnand %p485_p0, %p138_p1 }
   0x5   : > { %s486_s14 = sshll.u32 (!%p139_p2), %s481_s13, 3  ;;  %vm191_vm0 = vcmask (!%p139_p2), 130048   ;;  %v542_v36 = vld [vmem:[%s731_s1] sm:$0xff] (!%p139_p2)   ;;  %vm416_vm1 = vcmask (!%p139_p2), 64512  }
   0x6   : > { %142 = sbr.rel (%p139_p2) target bundleno = 432 (0x1b0), region = 32  ;;  %p163_p3 = scmp.lt.s32.totalorder (!%p139_p2), %s486_s14, 15  ;;  %522 = vmatprep.subr.bf16.mxu0 (!%p139_p2), %v542_v36  ;;  %532 = vmatprep.subr.bf16.mxu1 (!%p139_p2), %v542_v36 }
   0x7   : > { %523 = vmatpush3.bf16.msra.mxu0 (!%p139_p2), %v542_v36  ;;  %533 = vmatpush3.bf16.msra.mxu1 (!%p139_p2), %v542_v36 }
   0xd   : > { %s735_s14 = smov (!%p163_p3, %s486_s14), 15 }
   0xe   : > { %s487_s15 = sshll.u32 %s735_s14, 2  ;;  %s489_s21 = sshll.u32 %s735_s14, 3 }
   0xf   : > { %s166_s18 = scalar_lea.vmem %s730_s0, %s487_s15  ;;  %s172_s26 = scalar_lea.vmem %s733_s3, %s489_s21 }
  0x10   : > { %v515_v0 = vld [vmem:[%s166_s18 + $0x10] sm:$0xff]   ;;  %v499_v1 = vld [vmem:[%s166_s18] sm:$0xff]   ;;  %v514_v6 = vld [vmem:[%s166_s18 + $0x8] sm:$0xff]  }
  0x11   : > { %v601_v2 = vunpack.c.l.bf16 %v515_v0  ;;  %v603_v3 = vunpack.c.l.bf16 %v499_v1  ;;  %v605_v4 = vunpack.c.h.bf16 %v515_v0  ;;  %v607_v5 = vunpack.c.h.bf16 %v499_v1  ;;  %v516_v13 = vld [vmem:[%s166_s18 + $0x18] sm:$0xff]  }
  0x12   : > { %v617_v11 = vunpack.c.h.bf16 %v514_v6  ;;  %v619_v12 = vunpack.c.l.bf16 %v514_v6  ;;  %v625_v16 = vunpack.c.h.bf16 %v516_v13  ;;  %v627_v17 = vunpack.c.l.bf16 %v516_v13 }
  0x13   : > { %v204_v7 = vsel %vm191_vm0, %v601_v2, 0.0  ;;  %v192_v8 = vsel %vm191_vm0, %v603_v3, 0.0  ;;  %v207_v9 = vsel %vm191_vm0, %v605_v4, 0.0  ;;  %v195_v10 = vsel %vm191_vm0, %v607_v5, 0.0 }
  0x14   : > { %205 = vadd.xlane.f32.xlu1 %v204_v7  ;;  %193 = vadd.xlane.f32.xlu0 %v192_v8  ;;  %v201_v14 = vsel %vm191_vm0, %v617_v11, 0.0  ;;  %v198_v15 = vsel %vm191_vm0, %v619_v12, 0.0  ;;  %v213_v18 = vsel %vm191_vm0, %v625_v16, 0.0  ;;  %v210_v19 = vsel %vm191_vm0, %v627_v17, 0.0 }
  0x15   : > { %v225_v20 = vmul.f32 %v607_v5, %v607_v5  ;;  %v224_v21 = vmul.f32 %v603_v3, %v603_v3  ;;  %v229_v24 = vmul.f32 %v605_v4, %v605_v4  ;;  %v228_v25 = vmul.f32 %v601_v2, %v601_v2 }
  0x16   : > { %v227_v28 = vmul.f32 %v617_v11, %v617_v11  ;;  %v226_v29 = vmul.f32 %v619_v12, %v619_v12  ;;  %v231_v32 = vmul.f32 %v625_v16, %v625_v16  ;;  %v230_v33 = vmul.f32 %v627_v17, %v627_v17 }
  0x17   : > { %v235_v22 = vsel %vm191_vm0, %v225_v20, 0.0  ;;  %v232_v23 = vsel %vm191_vm0, %v224_v21, 0.0  ;;  %v247_v26 = vsel %vm191_vm0, %v229_v24, 0.0  ;;  %v244_v27 = vsel %vm191_vm0, %v228_v25, 0.0 }
  0x18   : > { %208 = vadd.xlane.f32.xlu1 %v207_v9  ;;  %196 = vadd.xlane.f32.xlu0 %v195_v10  ;;  %v241_v30 = vsel %vm191_vm0, %v227_v28, 0.0  ;;  %v238_v31 = vsel %vm191_vm0, %v226_v29, 0.0  ;;  %v253_v34 = vsel %vm191_vm0, %v231_v32, 0.0  ;;  %v250_v35 = vsel %vm191_vm0, %v230_v33, 0.0 }
  0x1c   : > { %202 = vadd.xlane.f32.xlu1 %v201_v14  ;;  %199 = vadd.xlane.f32.xlu0 %v198_v15 }
  0x20   : > { %214 = vadd.xlane.f32.xlu1 %v213_v18  ;;  %211 = vadd.xlane.f32.xlu0 %v210_v19 }
  0x24   : > { %236 = vadd.xlane.f32.xlu1 %v235_v22  ;;  %233 = vadd.xlane.f32.xlu0 %v232_v23 }
  0x28   : > { %248 = vadd.xlane.f32.xlu1 %v247_v26  ;;  %245 = vadd.xlane.f32.xlu0 %v244_v27 }
  0x2c   : > { %242 = vadd.xlane.f32.xlu1 %v241_v30  ;;  %239 = vadd.xlane.f32.xlu0 %v238_v31 }
  0x30   : > { %254 = vadd.xlane.f32.xlu1 %v253_v34  ;;  %251 = vadd.xlane.f32.xlu0 %v250_v35 }
  0xa1   : > { %v206_v37 = vpop.xlane.xlu1 %205  ;;  %v194_v38 = vpop.xlane.xlu0 %193 }
  0xa2   : > { %v660_v45 = vmul.f32 0.0625, %v194_v38  ;;  %v664_v47 = vmul.f32 0.0625, %v206_v37 }
  0xa4   : > { %v264_v51 = vmul.f32 %v660_v45, %v660_v45  ;;  %v268_v57 = vmul.f32 %v664_v47, %v664_v47 }
  0xa5   : > { %v209_v39 = vpop.xlane.xlu1 %208  ;;  %v197_v40 = vpop.xlane.xlu0 %196 }
  0xa6   : > { %v662_v46 = vmul.f32 0.0625, %v197_v40  ;;  %v666_v48 = vmul.f32 0.0625, %v209_v39 }
  0xa8   : > { %v265_v52 = vmul.f32 %v662_v46, %v662_v46  ;;  %v269_v58 = vmul.f32 %v666_v48, %v666_v48 }
  0xa9   : > { %v203_v41 = vpop.xlane.xlu1 %202  ;;  %v200_v42 = vpop.xlane.xlu0 %199 }
  0xaa   : > { %v676_v59 = vmul.f32 0.0625, %v203_v41  ;;  %v678_v6 = vmul.f32 0.0625, %v200_v42 }
  0xac   : > { %v267_v13 = vmul.f32 %v676_v59, %v676_v59  ;;  %v266_v23 = vmul.f32 %v678_v6, %v678_v6 }
  0xad   : > { %v215_v43 = vpop.xlane.xlu1 %214  ;;  %v212_v44 = vpop.xlane.xlu0 %211 }
  0xae   : > { %v682_v14 = vmul.f32 0.0625, %v215_v43  ;;  %v684_v15 = vmul.f32 0.0625, %v212_v44  ;;  %v305_v43 = vsub.f32 %v607_v5, %v662_v46 }
  0xb0   : > { %v271_v28 = vmul.f32 %v682_v14, %v682_v14  ;;  %v270_v29 = vmul.f32 %v684_v15, %v684_v15 }
  0xb1   : > { %v237_v49 = vpop.xlane.xlu1 %236  ;;  %v234_v50 = vpop.xlane.xlu0 %233 }
  0xb2   : > { %v257_v53 = vmul.f32 0.0625, %v237_v49  ;;  %v256_v54 = vmul.f32 0.0625, %v234_v50  ;;  %v304_v49 = vsub.f32 %v603_v3, %v660_v45  ;;  %v307_v45 = vsub.f32 %v617_v11, %v676_v59 }
  0xb4   : > { %v273_v55 = vsub.f32 %v257_v53, %v265_v52  ;;  %v272_v56 = vsub.f32 %v256_v54, %v264_v51 }
  0xb5   : > { %v249_v60 = vpop.xlane.xlu1 %248  ;;  %v246_v61 = vpop.xlane.xlu0 %245 }
  0xb6   : > { %v281_v62 = vmax.f32 %v273_v55, 0.0  ;;  %v280_v63 = vmax.f32 %v272_v56, 0.0  ;;  %v261_v0 = vmul.f32 0.0625, %v249_v60  ;;  %v260_v1 = vmul.f32 0.0625, %v246_v61 }
  0xb7   : > { %v309_v55 = vsub.f32 %v605_v4, %v666_v48  ;;  %v306_v61 = vsub.f32 %v619_v12, %v678_v6 }
  0xb8   : > { %v289_v7 = vadd.f32 1e-05, %v281_v62  ;;  %v288_v8 = vadd.f32 1e-05, %v280_v63  ;;  %v277_v9 = vsub.f32 %v261_v0, %v269_v58  ;;  %v276_v10 = vsub.f32 %v260_v1, %v268_v57 }
  0xb9   : > { %v243_v18 = vpop.xlane.xlu1 %242  ;;  %v240_v19 = vpop.xlane.xlu0 %239  ;;  %v308_v57 = vsub.f32 %v601_v2, %v664_v47  ;;  %v311_v47 = vsub.f32 %v625_v16, %v682_v14  ;;  %v310_v0 = vsub.f32 %v627_v17, %v684_v15 }
  0xba   : > { %543 = vrsqrt.f32 %v289_v7  ;;  %v285_v20 = vmax.f32 %v277_v9, 0.0  ;;  %v284_v21 = vmax.f32 %v276_v10, 0.0  ;;  %v259_v22 = vmul.f32 0.0625, %v243_v18  ;;  %v490_v7 = vld [vmem:[%s732_s2] ss:$0 sm:$0xff] }
  0xbb   : > { %545 = vrsqrt.f32 %v288_v8  ;;  %v258_v24 = vmul.f32 0.0625, %v240_v19 }
  0xbc   : > { %v293_v25 = vadd.f32 1e-05, %v285_v20  ;;  %v292_v26 = vadd.f32 1e-05, %v284_v21  ;;  %v275_v27 = vsub.f32 %v259_v22, %v267_v13 }
  0xbd   : > { %v274_v30 = vsub.f32 %v258_v24, %v266_v23  ;;  %v255_v31 = vpop.xlane.xlu1 %254  ;;  %v252_v32 = vpop.xlane.xlu0 %251 }
  0xbe   : > { %547 = vrsqrt.f32 %v293_v25  ;;  %v283_v33 = vmax.f32 %v275_v27, 0.0  ;;  %v263_v34 = vmul.f32 0.0625, %v255_v31  ;;  %v262_v35 = vmul.f32 0.0625, %v252_v32 }
  0xbf   : > { %549 = vrsqrt.f32 %v292_v26  ;;  %v282_v36 = vmax.f32 %v274_v30, 0.0 }
  0xc0   : > { %v291_v37 = vadd.f32 1e-05, %v283_v33  ;;  %v279_v38 = vsub.f32 %v263_v34, %v271_v28  ;;  %v278_v39 = vsub.f32 %v262_v35, %v270_v29 }
  0xc1   : > { %v290_v40 = vadd.f32 1e-05, %v282_v36 }
  0xc2   : > { %551 = vrsqrt.f32 %v291_v37  ;;  %v287_v41 = vmax.f32 %v279_v38, 0.0  ;;  %v286_v42 = vmax.f32 %v278_v39, 0.0 }
  0xc3   : > { %553 = vrsqrt.f32 %v290_v40 }
  0xc4   : > { %v544_v44 = vpop.eup %543  ;;  %v295_v50 = vadd.f32 1e-05, %v287_v41  ;;  %v294_v51 = vadd.f32 1e-05, %v286_v42 }
  0xc5   : > { %v546_v52 = vpop.eup %545  ;;  %v313_v53 = vmul.f32 %v544_v44, %v305_v43 }
  0xc6   : > { %555 = vrsqrt.f32 %v295_v50  ;;  %v312_v54 = vmul.f32 %v546_v52, %v304_v49 }
  0xc7   : > { %557 = vrsqrt.f32 %v294_v51 }
  0xc8   : > { %v548_v56 = vpop.eup %547  ;;  %v320_v5 = vpack.c.bf16 %v313_v53, %v312_v54 }
  0xc9   : > { %v550_v46 = vpop.eup %549  ;;  %v317_v58 = vmul.f32 %v548_v56, %v309_v55 }
  0xca   : > { %524 = vmatprep.mubr.msk.bf16.mxu0 %vm191_vm0, %v320_v5  ;;  %v316_v3 = vmul.f32 %v550_v46, %v308_v57 }
  0xcc   : > { %v552_v60 = vpop.eup %551  ;;  %v322_v4 = vpack.c.bf16 %v317_v58, %v316_v3 }
  0xcd   : > { %v554_v48 = vpop.eup %553  ;;  %v315_v62 = vmul.f32 %v552_v60, %v307_v45 }
  0xce   : > { %528 = vmatprep.mubr.msk.bf16.mxu1 %vm191_vm0, %v322_v4  ;;  %v314_v2 = vmul.f32 %v554_v48, %v306_v61 }
  0xd0   : > { %v556_v63 = vpop.eup %555  ;;  %v321_v1 = vpack.c.bf16 %v315_v62, %v314_v2 }
  0xd1   : > { %v558_v11 = vpop.eup %557  ;;  %v319_v59 = vmul.f32 %v556_v63, %v311_v47 }
  0xd2   : > { %525 = vmatmul.mubr.msk.bf16.vlgmr.msra.gmra.mrb[0].mxu0 %vm191_vm0, %v321_v1  ;;  %v318_v12 = vmul.f32 %v558_v11, %v310_v0 }
  0xd4   : > { %v323_v6 = vpack.c.bf16 %v319_v59, %v318_v12 }
  0xd6   : > { %529 = vmatmul.mubr.msk.bf16.vlgmr.msra.gmra.mrb[0].mxu1 %vm191_vm0, %v323_v6 }
 0x1a5   : > { %v526_v16 = vpop.f32.mrb[0].mxu0 }
 0x1a6   : > { %v394_v17 = vadd.f32 %v526_v16, %v490_v7  ;;  %v385_v8 = vpop.f32.mrb[1].mxu0 }
 0x1a7   : > { %v386_v9 = vadd.f32 %v490_v7, %v385_v8  ;;  %v527_v10 = vpop.f32.mrb[2].mxu0 }
 0x1a8   : > { %419 = vst.msk [vmem:[%s172_s26 + $0x10] sm:$0xff] %vm416_vm1, %v394_v17  ;;  %v397_v13 = vadd.f32 %v527_v10, %v490_v7  ;;  %v388_v14 = vpop.f32.mrb[3].mxu0 }
 0x1a9   : > { %417 = vst.msk [vmem:[%s172_s26] sm:$0xff] %vm416_vm1, %v386_v9  ;;  %v389_v15 = vadd.f32 %v490_v7, %v388_v14  ;;  %v530_v18 = vpop.f32.mrb[0].mxu1 }
 0x1aa   : > { %420 = vst.msk [vmem:[%s172_s26 + $0x18] sm:$0xff] %vm416_vm1, %v397_v13  ;;  %v410_v19 = vadd.f32 %v530_v18, %v490_v7  ;;  %v401_v20 = vpop.f32.mrb[1].mxu1 }
 0x1ab   : > { %418 = vst.msk [vmem:[%s172_s26 + $0x8] sm:$0xff] %vm416_vm1, %v389_v15  ;;  %v402_v21 = vadd.f32 %v490_v7, %v401_v20  ;;  %v531_v22 = vpop.f32.mrb[2].mxu1 }
 0x1ac   : > { %423 = vst.msk [vmem:[%s172_s26 + $0x30] sm:$0xff] %vm416_vm1, %v410_v19  ;;  %v413_v23 = vadd.f32 %v531_v22, %v490_v7  ;;  %v404_v24 = vpop.f32.mrb[3].mxu1 }
 0x1ad   : > { %421 = vst.msk [vmem:[%s172_s26 + $0x20] sm:$0xff] %vm416_vm1, %v402_v21  ;;  %v405_v25 = vadd.f32 %v490_v7, %v404_v24 }
 0x1ae   : > { %424 = vst.msk [vmem:[%s172_s26 + $0x38] sm:$0xff] %vm416_vm1, %v413_v23 }
 0x1af   : > { %422 = vst.msk [vmem:[%s172_s26 + $0x28] sm:$0xff] %vm416_vm1, %v405_v25 }
 0x1b0 PF: > { %s13_s12 = sadd.s32 1, %s565_s12  }
 0x1b1   : > { %p10_p4 = scmp.ge.s32.totalorder %s13_s12, 4  }
 0x1b3   :  { %12 = sbr.rel (!%p10_p4) target bundleno = 1 (0x1), region = 62 }

// kernel: patch_merging_forward.1
= control target key start
LH: loop header
LB: loop body
LE: loop exit
PB: predicated region body
PF: predicated region fallthrough
CT: control target
= control target key end

     0   :  { %s587_s12 = smov 0   ;;  %s730_s0 = inlined_call_operand.vmem [shape: bf16[128,16], index: 0, kind: input, shape index: {}]   ;;  %s731_s1 = inlined_call_operand.vmem [shape: bf16[16,8], index: 1, kind: input, shape index: {}]   ;;  %s732_s2 = inlined_call_operand.vmem [shape: f32[1,8], index: 2, kind: input, shape index: {}]   ;;  %s733_s3 = inlined_call_operand.vmem [shape: f32[128,8], index: 3, kind: output, shape index: {}]  }
   0x1 LB: > { %s481_s13 = sadd.s32 4294967295, %s565_s12   ;;  %p485_p0 = scmp.ge.s32.totalorder %s565_s12, 1  ;;  %s565_s12 = sphi %s587_s12, %s13_s12  }
   0x2   : > { %p138_p1 = scmp.lt.s32.totalorder %s565_s12, 3 }
   0x4   : > { %p139_p2 = pnand %p485_p0, %p138_p1 }
   0x5   : > { %s486_s14 = sshll.u32 (!%p139_p2), %s481_s13, 3  ;;  %vm191_vm0 = vcmask (!%p139_p2), 130048   ;;  %v542_v36 = vld [vmem:[%s731_s1] sm:$0xff] (!%p139_p2)   ;;  %vm416_vm1 = vcmask (!%p139_p2), 64512  }
   0x6   : > { %142 = sbr.rel (%p139_p2) target bundleno = 432 (0x1b0), region = 32  ;;  %p163_p3 = scmp.lt.s32.totalorder (!%p139_p2), %s486_s14, 15  ;;  %522 = vmatprep.subr.bf16.mxu0 (!%p139_p2), %v542_v36  ;;  %532 = vmatprep.subr.bf16.mxu1 (!%p139_p2), %v542_v36 }
   0x7   : > { %523 = vmatpush3.bf16.msra.mxu0 (!%p139_p2), %v542_v36  ;;  %533 = vmatpush3.bf16.msra.mxu1 (!%p139_p2), %v542_v36 }
   0xd   : > { %s735_s14 = smov (!%p163_p3, %s486_s14), 15 }
   0xe   : > { %s487_s15 = sshll.u32 %s735_s14, 2  ;;  %s489_s21 = sshll.u32 %s735_s14, 3 }
   0xf   : > { %s166_s18 = scalar_lea.vmem %s730_s0, %s487_s15  ;;  %s172_s26 = scalar_lea.vmem %s733_s3, %s489_s21 }
  0x10   : > { %v515_v0 = vld [vmem:[%s166_s18 + $0x10] sm:$0xff]   ;;  %v499_v1 = vld [vmem:[%s166_s18] sm:$0xff]   ;;  %v514_v6 = vld [vmem:[%s166_s18 + $0x8] sm:$0xff]  }
  0x11   : > { %v601_v2 = vunpack.c.l.bf16 %v515_v0  ;;  %v603_v3 = vunpack.c.l.bf16 %v499_v1  ;;  %v605_v4 = vunpack.c.h.bf16 %v515_v0  ;;  %v607_v5 = vunpack.c.h.bf16 %v499_v1  ;;  %v516_v13 = vld [vmem:[%s166_s18 + $0x18] sm:$0xff]  }
  0x12   : > { %v617_v11 = vunpack.c.h.bf16 %v514_v6  ;;  %v619_v12 = vunpack.c.l.bf16 %v514_v6  ;;  %v625_v16 = vunpack.c.h.bf16 %v516_v13  ;;  %v627_v17 = vunpack.c.l.bf16 %v516_v13 }
  0x13   : > { %v204_v7 = vsel %vm191_vm0, %v601_v2, 0.0  ;;  %v192_v8 = vsel %vm191_vm0, %v603_v3, 0.0  ;;  %v207_v9 = vsel %vm191_vm0, %v605_v4, 0.0  ;;  %v195_v10 = vsel %vm191_vm0, %v607_v5, 0.0 }
  0x14   : > { %205 = vadd.xlane.f32.xlu1 %v204_v7  ;;  %193 = vadd.xlane.f32.xlu0 %v192_v8  ;;  %v201_v14 = vsel %vm191_vm0, %v617_v11, 0.0  ;;  %v198_v15 = vsel %vm191_vm0, %v619_v12, 0.0  ;;  %v213_v18 = vsel %vm191_vm0, %v625_v16, 0.0  ;;  %v210_v19 = vsel %vm191_vm0, %v627_v17, 0.0 }
  0x15   : > { %v225_v20 = vmul.f32 %v607_v5, %v607_v5  ;;  %v224_v21 = vmul.f32 %v603_v3, %v603_v3  ;;  %v229_v24 = vmul.f32 %v605_v4, %v605_v4  ;;  %v228_v25 = vmul.f32 %v601_v2, %v601_v2 }
  0x16   : > { %v227_v28 = vmul.f32 %v617_v11, %v617_v11  ;;  %v226_v29 = vmul.f32 %v619_v12, %v619_v12  ;;  %v231_v32 = vmul.f32 %v625_v16, %v625_v16  ;;  %v230_v33 = vmul.f32 %v627_v17, %v627_v17 }
  0x17   : > { %v235_v22 = vsel %vm191_vm0, %v225_v20, 0.0  ;;  %v232_v23 = vsel %vm191_vm0, %v224_v21, 0.0  ;;  %v247_v26 = vsel %vm191_vm0, %v229_v24, 0.0  ;;  %v244_v27 = vsel %vm191_vm0, %v228_v25, 0.0 }
  0x18   : > { %208 = vadd.xlane.f32.xlu1 %v207_v9  ;;  %196 = vadd.xlane.f32.xlu0 %v195_v10  ;;  %v241_v30 = vsel %vm191_vm0, %v227_v28, 0.0  ;;  %v238_v31 = vsel %vm191_vm0, %v226_v29, 0.0  ;;  %v253_v34 = vsel %vm191_vm0, %v231_v32, 0.0  ;;  %v250_v35 = vsel %vm191_vm0, %v230_v33, 0.0 }
  0x1c   : > { %202 = vadd.xlane.f32.xlu1 %v201_v14  ;;  %199 = vadd.xlane.f32.xlu0 %v198_v15 }
  0x20   : > { %214 = vadd.xlane.f32.xlu1 %v213_v18  ;;  %211 = vadd.xlane.f32.xlu0 %v210_v19 }
  0x24   : > { %236 = vadd.xlane.f32.xlu1 %v235_v22  ;;  %233 = vadd.xlane.f32.xlu0 %v232_v23 }
  0x28   : > { %248 = vadd.xlane.f32.xlu1 %v247_v26  ;;  %245 = vadd.xlane.f32.xlu0 %v244_v27 }
  0x2c   : > { %242 = vadd.xlane.f32.xlu1 %v241_v30  ;;  %239 = vadd.xlane.f32.xlu0 %v238_v31 }
  0x30   : > { %254 = vadd.xlane.f32.xlu1 %v253_v34  ;;  %251 = vadd.xlane.f32.xlu0 %v250_v35 }
  0xa1   : > { %v206_v37 = vpop.xlane.xlu1 %205  ;;  %v194_v38 = vpop.xlane.xlu0 %193 }
  0xa2   : > { %v660_v45 = vmul.f32 0.0625, %v194_v38  ;;  %v664_v47 = vmul.f32 0.0625, %v206_v37 }
  0xa4   : > { %v264_v51 = vmul.f32 %v660_v45, %v660_v45  ;;  %v268_v57 = vmul.f32 %v664_v47, %v664_v47 }
  0xa5   : > { %v209_v39 = vpop.xlane.xlu1 %208  ;;  %v197_v40 = vpop.xlane.xlu0 %196 }
  0xa6   : > { %v662_v46 = vmul.f32 0.0625, %v197_v40  ;;  %v666_v48 = vmul.f32 0.0625, %v209_v39 }
  0xa8   : > { %v265_v52 = vmul.f32 %v662_v46, %v662_v46  ;;  %v269_v58 = vmul.f32 %v666_v48, %v666_v48 }
  0xa9   : > { %v203_v41 = vpop.xlane.xlu1 %202  ;;  %v200_v42 = vpop.xlane.xlu0 %199 }
  0xaa   : > { %v676_v59 = vmul.f32 0.0625, %v203_v41  ;;  %v678_v6 = vmul.f32 0.0625, %v200_v42 }
  0xac   : > { %v267_v13 = vmul.f32 %v676_v59, %v676_v59  ;;  %v266_v23 = vmul.f32 %v678_v6, %v678_v6 }
  0xad   : > { %v215_v43 = vpop.xlane.xlu1 %214  ;;  %v212_v44 = vpop.xlane.xlu0 %211 }
  0xae   : > { %v682_v14 = vmul.f32 0.0625, %v215_v43  ;;  %v684_v15 = vmul.f32 0.0625, %v212_v44  ;;  %v305_v43 = vsub.f32 %v607_v5, %v662_v46 }
  0xb0   : > { %v271_v28 = vmul.f32 %v682_v14, %v682_v14  ;;  %v270_v29 = vmul.f32 %v684_v15, %v684_v15 }
  0xb1   : > { %v237_v49 = vpop.xlane.xlu1 %236  ;;  %v234_v50 = vpop.xlane.xlu0 %233 }
  0xb2   : > { %v257_v53 = vmul.f32 0.0625, %v237_v49  ;;  %v256_v54 = vmul.f32 0.0625, %v234_v50  ;;  %v304_v49 = vsub.f32 %v603_v3, %v660_v45  ;;  %v307_v45 = vsub.f32 %v617_v11, %v676_v59 }
  0xb4   : > { %v273_v55 = vsub.f32 %v257_v53, %v265_v52  ;;  %v272_v56 = vsub.f32 %v256_v54, %v264_v51 }
  0xb5   : > { %v249_v60 = vpop.xlane.xlu1 %248  ;;  %v246_v61 = vpop.xlane.xlu0 %245 }
  0xb6   : > { %v281_v62 = vmax.f32 %v273_v55, 0.0  ;;  %v280_v63 = vmax.f32 %v272_v56, 0.0  ;;  %v261_v0 = vmul.f32 0.0625, %v249_v60  ;;  %v260_v1 = vmul.f32 0.0625, %v246_v61 }
  0xb7   : > { %v309_v55 = vsub.f32 %v605_v4, %v666_v48  ;;  %v306_v61 = vsub.f32 %v619_v12, %v678_v6 }
  0xb8   : > { %v289_v7 = vadd.f32 1e-05, %v281_v62  ;;  %v288_v8 = vadd.f32 1e-05, %v280_v63  ;;  %v277_v9 = vsub.f32 %v261_v0, %v269_v58  ;;  %v276_v10 = vsub.f32 %v260_v1, %v268_v57 }
  0xb9   : > { %v243_v18 = vpop.xlane.xlu1 %242  ;;  %v240_v19 = vpop.xlane.xlu0 %239  ;;  %v308_v57 = vsub.f32 %v601_v2, %v664_v47  ;;  %v311_v47 = vsub.f32 %v625_v16, %v682_v14  ;;  %v310_v0 = vsub.f32 %v627_v17, %v684_v15 }
  0xba   : > { %543 = vrsqrt.f32 %v289_v7  ;;  %v285_v20 = vmax.f32 %v277_v9, 0.0  ;;  %v284_v21 = vmax.f32 %v276_v10, 0.0  ;;  %v259_v22 = vmul.f32 0.0625, %v243_v18  ;;  %v490_v7 = vld [vmem:[%s732_s2] ss:$0 sm:$0xff] }
  0xbb   : > { %545 = vrsqrt.f32 %v288_v8  ;;  %v258_v24 = vmul.f32 0.0625, %v240_v19 }
  0xbc   : > { %v293_v25 = vadd.f32 1e-05, %v285_v20  ;;  %v292_v26 = vadd.f32 1e-05, %v284_v21  ;;  %v275_v27 = vsub.f32 %v259_v22, %v267_v13 }
  0xbd   : > { %v274_v30 = vsub.f32 %v258_v24, %v266_v23  ;;  %v255_v31 = vpop.xlane.xlu1 %254  ;;  %v252_v32 = vpop.xlane.xlu0 %251 }
  0xbe   : > { %547 = vrsqrt.f32 %v293_v25  ;;  %v283_v33 = vmax.f32 %v275_v27, 0.0  ;;  %v263_v34 = vmul.f32 0.0625, %v255_v31  ;;  %v262_v35 = vmul.f32 0.0625, %v252_v32 }
  0xbf   : > { %549 = vrsqrt.f32 %v292_v26  ;;  %v282_v36 = vmax.f32 %v274_v30, 0.0 }
  0xc0   : > { %v291_v37 = vadd.f32 1e-05, %v283_v33  ;;  %v279_v38 = vsub.f32 %v263_v34, %v271_v28  ;;  %v278_v39 = vsub.f32 %v262_v35, %v270_v29 }
  0xc1   : > { %v290_v40 = vadd.f32 1e-05, %v282_v36 }
  0xc2   : > { %551 = vrsqrt.f32 %v291_v37  ;;  %v287_v41 = vmax.f32 %v279_v38, 0.0  ;;  %v286_v42 = vmax.f32 %v278_v39, 0.0 }
  0xc3   : > { %553 = vrsqrt.f32 %v290_v40 }
  0xc4   : > { %v544_v44 = vpop.eup %543  ;;  %v295_v50 = vadd.f32 1e-05, %v287_v41  ;;  %v294_v51 = vadd.f32 1e-05, %v286_v42 }
  0xc5   : > { %v546_v52 = vpop.eup %545  ;;  %v313_v53 = vmul.f32 %v544_v44, %v305_v43 }
  0xc6   : > { %555 = vrsqrt.f32 %v295_v50  ;;  %v312_v54 = vmul.f32 %v546_v52, %v304_v49 }
  0xc7   : > { %557 = vrsqrt.f32 %v294_v51 }
  0xc8   : > { %v548_v56 = vpop.eup %547  ;;  %v320_v5 = vpack.c.bf16 %v313_v53, %v312_v54 }
  0xc9   : > { %v550_v46 = vpop.eup %549  ;;  %v317_v58 = vmul.f32 %v548_v56, %v309_v55 }
  0xca   : > { %524 = vmatprep.mubr.msk.bf16.mxu0 %vm191_vm0, %v320_v5  ;;  %v316_v3 = vmul.f32 %v550_v46, %v308_v57 }
  0xcc   : > { %v552_v60 = vpop.eup %551  ;;  %v322_v4 = vpack.c.bf16 %v317_v58, %v316_v3 }
  0xcd   : > { %v554_v48 = vpop.eup %553  ;;  %v315_v62 = vmul.f32 %v552_v60, %v307_v45 }
  0xce   : > { %528 = vmatprep.mubr.msk.bf16.mxu1 %vm191_vm0, %v322_v4  ;;  %v314_v2 = vmul.f32 %v554_v48, %v306_v61 }
  0xd0   : > { %v556_v63 = vpop.eup %555  ;;  %v321_v1 = vpack.c.bf16 %v315_v62, %v314_v2 }
  0xd1   : > { %v558_v11 = vpop.eup %557  ;;  %v319_v59 = vmul.f32 %v556_v63, %v311_v47 }
  0xd2   : > { %525 = vmatmul.mubr.msk.bf16.vlgmr.msra.gmra.mrb[0].mxu0 %vm191_vm0, %v321_v1  ;;  %v318_v12 = vmul.f32 %v558_v11, %v310_v0 }
  0xd4   : > { %v323_v6 = vpack.c.bf16 %v319_v59, %v318_v12 }
  0xd6   : > { %529 = vmatmul.mubr.msk.bf16.vlgmr.msra.gmra.mrb[0].mxu1 %vm191_vm0, %v323_v6 }
 0x1a5   : > { %v526_v16 = vpop.f32.mrb[0].mxu0 }
 0x1a6   : > { %v394_v17 = vadd.f32 %v526_v16, %v490_v7  ;;  %v385_v8 = vpop.f32.mrb[1].mxu0 }
 0x1a7   : > { %v386_v9 = vadd.f32 %v490_v7, %v385_v8  ;;  %v527_v10 = vpop.f32.mrb[2].mxu0 }
 0x1a8   : > { %419 = vst.msk [vmem:[%s172_s26 + $0x10] sm:$0xff] %vm416_vm1, %v394_v17  ;;  %v397_v13 = vadd.f32 %v527_v10, %v490_v7  ;;  %v388_v14 = vpop.f32.mrb[3].mxu0 }
 0x1a9   : > { %417 = vst.msk [vmem:[%s172_s26] sm:$0xff] %vm416_vm1, %v386_v9  ;;  %v389_v15 = vadd.f32 %v490_v7, %v388_v14  ;;  %v530_v18 = vpop.f32.mrb[0].mxu1 }
 0x1aa   : > { %420 = vst.msk [vmem:[%s172_s26 + $0x18] sm:$0xff] %vm416_vm1, %v397_v13  ;;  %v410_v19 = vadd.f32 %v530_v18, %v490_v7  ;;  %v401_v20 = vpop.f32.mrb[1].mxu1 }
 0x1ab   : > { %418 = vst.msk [vmem:[%s172_s26 + $0x8] sm:$0xff] %vm416_vm1, %v389_v15  ;;  %v402_v21 = vadd.f32 %v490_v7, %v401_v20  ;;  %v531_v22 = vpop.f32.mrb[2].mxu1 }
 0x1ac   : > { %423 = vst.msk [vmem:[%s172_s26 + $0x30] sm:$0xff] %vm416_vm1, %v410_v19  ;;  %v413_v23 = vadd.f32 %v531_v22, %v490_v7  ;;  %v404_v24 = vpop.f32.mrb[3].mxu1 }
 0x1ad   : > { %421 = vst.msk [vmem:[%s172_s26 + $0x20] sm:$0xff] %vm416_vm1, %v402_v21  ;;  %v405_v25 = vadd.f32 %v490_v7, %v404_v24 }
 0x1ae   : > { %424 = vst.msk [vmem:[%s172_s26 + $0x38] sm:$0xff] %vm416_vm1, %v413_v23 }
 0x1af   : > { %422 = vst.msk [vmem:[%s172_s26 + $0x28] sm:$0xff] %vm416_vm1, %v405_v25 }
 0x1b0 PF: > { %s13_s12 = sadd.s32 1, %s565_s12  }
 0x1b1   : > { %p10_p4 = scmp.ge.s32.totalorder %s13_s12, 4  }
 0x1b3   :  { %12 = sbr.rel (!%p10_p4) target bundleno = 1 (0x1), region = 62 }

</bundles_post_ra>
